<compile_context>
chip_gen: v7x
topology: tpu7x:2x2x1
jax: 0.10.0
libtpu: 0.0.40
codegen_flags: <defaults>
</compile_context>

<pallas_src>
import functools

import jax
import jax.numpy as jnp
from jax import lax
from jax.experimental import pallas as pl
from jax.experimental.pallas import tpu as pltpu


# ----------------------------------------------------------------------------
# Pallas kernel: conv1 -> bias+LeakyReLU -> conv2 (y-half + rem-half) -> bias+LeakyReLU
# ----------------------------------------------------------------------------
def _conv2x_kernel(x1_ref, rem_ref, w1_ref, b1_ref, w2y_ref, w2r_ref, b2_ref,
                   out_ref, *, M2):
    # Shapes (R = N*(Ho+2), M2 = R-2, L1 = Wo*Cout, L2 = Wo*C2out):
    #   x1_ref : (R, 2*(Wo+1)*4Cin) bf16  conv1 im2col (kh taps), tall layout
    #   rem_ref: (M2, 3*L1)         bf16  rem im2col (kh taps)
    #   w1_ref : (2*(Wo+1)*4Cin,L1) bf16  banded conv1 weight, BN1 scale folded
    #   b1_ref : (R, L1)            f32   BN1 bias, zero on inter-batch H-pad rows
    #   w2y_ref: (3, L1, L2)        bf16  banded conv2 weight (y half), per kh tap
    #   w2r_ref: (3*L1, L2)         bf16  banded conv2 weight (rem half)
    #   b2_ref : (1, L2)            f32   BN2 bias
    #   out_ref: (M2, L2)           bf16  lane-dense output slab

    # ---- conv1: one MXU dot over all batches/rows; epilogue = bias + LeakyReLU ----
    acc1 = jnp.dot(x1_ref[...], w1_ref[...], preferred_element_type=jnp.float32)
    y1 = acc1 + b1_ref[...]
    y1 = jnp.maximum(y1, 0.01 * y1).astype(jnp.bfloat16)   # H-pad rows stay exactly 0

    # ---- conv2: rem half = one dot; y half = 3 accumulated per-kh dots on
    #      contiguous row-shifted slices of y1.  Single f32 accumulator. ----
    acc2 = jnp.dot(rem_ref[...], w2r_ref[...], preferred_element_type=jnp.float32)
    for kh in range(3):
        acc2 = acc2 + jnp.dot(y1[kh:kh + M2, :], w2y_ref[kh],
                              preferred_element_type=jnp.float32)
    y2 = acc2 + b2_ref[...]
    out_ref[...] = jnp.maximum(y2, 0.01 * y2).astype(out_ref.dtype)


# ----------------------------------------------------------------------------
# Glue: BN folding and banded-weight builders (all built once in the wrapper)
# ----------------------------------------------------------------------------
def _fold_bn(gamma, beta, mean, var, eps=1e-5):
    s = gamma / jnp.sqrt(var + eps)
    return s, beta - mean * s


def _pack_conv1_weight(w1, Wo):
    """3x3 stride-2 conv -> banded (2*(Wo+1)*4Cin, Wo*Cout) matrix.

    LHS row layout matches the wrapper im2col: row = bh*(Wo+1)*4Cin + wp*4Cin + c
    with c = (ph*2+pw)*Cin + ci (space-to-depth, pad-before W).  Column =
    w*Cout + co.  The W taps live in the band wp == w + bw; out-of-range taps
    are simply absent (== zero padding).
    """
    Cout, Cin = w1.shape[0], w1.shape[1]
    C1 = 4 * Cin
    w1h = jnp.transpose(w1, (2, 3, 1, 0))                     # (kh, kw, ci, co)
    ws2d = jnp.zeros((2, 2, 2, 2, Cin, Cout), jnp.float32)    # (bh, bw, ph, pw, ci, co)
    for bh in range(2):
        for ph in range(2):
            kh = 2 * bh + ph - 1
            if kh < 0:
                continue
            for bw in range(2):
                for pw in range(2):
                    kw = 2 * bw + pw - 1
                    if kw < 0:
                        continue
                    ws2d = ws2d.at[bh, bw, ph, pw].set(w1h[kh, kw])
    ws2d = ws2d.reshape(2, 2, C1, Cout)

    taps = []
    for bh in range(2):
        acc = jnp.zeros((Wo + 1, C1, Wo, Cout), jnp.float32)
        for bw in range(2):
            sel = jnp.eye(Wo + 1, Wo, k=-bw, dtype=jnp.float32)   # sel[wp,w] = (wp == w+bw)
            acc = acc + jnp.einsum("pw,co->pcwo", sel, ws2d[bh, bw])
        taps.append(acc)
    m = jnp.stack(taps, axis=0)                                # (2, Wo+1, C1, Wo, Cout)
    return m.reshape(2 * (Wo + 1) * C1, Wo * Cout)


def _pack_conv2_weights(w2, Cout, Wo):
    """3x3 stride-1 conv over cat([y, rem]) -> per-kh banded weight matrices.

    Returns (w2y, w2r): w2y[kh] is (Wo*Cout, Wo*C2out) for the conv1-output
    half; w2r is (3*Wo*Cout, Wo*C2out), kh-major, for the rem half.  Row =
    wp*Cout + ci, column = w*C2out + co, band wp == w + kw - 1 (out-of-range
    taps absent == zero W padding).
    """
    C2out = w2.shape[0]
    w2h = jnp.transpose(w2, (2, 3, 1, 0))                      # (kh, kw, ci2, co)

    def band(kh, lo, hi):
        acc = jnp.zeros((Wo, hi - lo, Wo, C2out), jnp.float32)
        for kw in range(3):
            sel = jnp.eye(Wo, Wo, k=1 - kw, dtype=jnp.float32)  # sel[wp,w] = (wp == w+kw-1)
            acc = acc + jnp.einsum("pw,co->pcwo", sel, w2h[kh, kw, lo:hi, :])
        return acc.reshape(Wo * (hi - lo), Wo * C2out)

    w2y = jnp.stack([band(kh, 0, Cout) for kh in range(3)], axis=0)
    w2r = jnp.concatenate([band(kh, Cout, 2 * Cout) for kh in range(3)], axis=0)
    return w2y, w2r


# ----------------------------------------------------------------------------
# Wrapper: layout prep (im2col / tall layout), BN fold, pallas_call
# ----------------------------------------------------------------------------
def conv2x_forward(x_nchw, rem_nchw, params, eps=1e-5):
    """Conv2x.forward (default config). x: (N,Cin,H,W), rem: (N,Cout,H//2,W//2)."""
    x = jnp.transpose(x_nchw, (0, 2, 3, 1)).astype(jnp.float32)       # NHWC
    remx = jnp.transpose(rem_nchw, (0, 2, 3, 1)).astype(jnp.float32)  # NHWC
    N, H, W, Cin = x.shape
    assert H % 2 == 0 and W % 2 == 0, "even spatial dims required (stride-2 conv1)"
    Ho, Wo = H // 2, W // 2

    w1 = params["w1"].astype(jnp.float32)      # (Cout, Cin, 3, 3)
    w2 = params["w2"].astype(jnp.float32)      # (C2out, 2*Cout, 3, 3)
    Cout, C2out = w1.shape[0], w2.shape[0]
    assert w2.shape[1] == 2 * Cout
    # TODO(synk): F.interpolate(nearest) path when shapes differ is not implemented.
    assert remx.shape == (N, Ho, Wo, Cout), "conv1 output and rem must share spatial dims"

    C1 = 4 * Cin
    K1 = 2 * (Wo + 1) * C1
    L1, L2 = Wo * Cout, Wo * C2out
    Hb = Ho + 2               # per-batch block height incl. conv2's H-pad rows
    R = N * Hb                # conv1 / y1 rows (tall layout)
    M2 = R - 2                # conv2 / output rows (3-tap valid layout)

    # ---- conv1 input: space-to-depth, pad-before, kh-tap im2col, tall layout ----
    xs = x.reshape(N, Ho, 2, Wo, 2, Cin).transpose(0, 1, 3, 2, 4, 5).reshape(N, Ho, Wo, C1)
    xsp = jnp.pad(xs, ((0, 0), (1, 0), (1, 0), (0, 0)))                # (N, Ho+1, Wo+1, C1)
    xf = xsp.reshape(N, Ho + 1, (Wo + 1) * C1)
    rows = jnp.concatenate([xf[:, 0:Ho, :], xf[:, 1:Ho + 1, :]], axis=-1)   # (N, Ho, K1)
    x1 = jnp.pad(rows, ((0, 0), (1, 1), (0, 0))).reshape(R, K1).astype(jnp.bfloat16)

    # ---- rem input: kh-tap im2col aligned to the conv2 output-row layout ----
    remp = jnp.pad(remx, ((0, 0), (1, 1), (0, 0), (0, 0))).reshape(N, Ho + 2, L1)
    rtaps = jnp.concatenate([remp[:, d:d + Ho, :] for d in range(3)], axis=-1)  # (N, Ho, 3*L1)
    rem_i2c = jnp.pad(rtaps, ((0, 0), (0, 2), (0, 0))).reshape(R, 3 * L1)[:M2]
    rem_i2c = rem_i2c.astype(jnp.bfloat16)

    # ---- weights: banded matrices with BN scale folded in (f32), then bf16 ----
    s1, b1 = _fold_bn(params["g1"], params["be1"], params["m1"], params["v1"], eps)
    s2, b2 = _fold_bn(params["g2"], params["be2"], params["m2"], params["v2"], eps)
    w1p = (_pack_conv1_weight(w1, Wo) * jnp.tile(s1, Wo)[None, :]).astype(jnp.bfloat16)
    w2y, w2r = _pack_conv2_weights(w2, Cout, Wo)
    s2t = jnp.tile(s2, Wo)
    w2y = (w2y * s2t[None, None, :]).astype(jnp.bfloat16)
    w2r = (w2r * s2t[None, :]).astype(jnp.bfloat16)

    # conv1 bias carried per-row: zero on the inter-batch H-pad rows so that
    # LeakyReLU(0 + 0) keeps them exactly 0 (they are conv2's zero H-padding).
    b1_rows = jnp.broadcast_to(jnp.tile(b1, Wo)[None, None, :], (N, Ho, L1))
    b1f = jnp.pad(b1_rows, ((0, 0), (1, 1), (0, 0))).reshape(R, L1)
    b2t = jnp.tile(b2, Wo)[None, :]

    kernel = functools.partial(_conv2x_kernel, M2=M2)

    out_slab = pl.pallas_call(
        kernel,
        out_shape=jax.ShapeDtypeStruct((M2, L2), jnp.bfloat16),
        grid=(1,),
        in_specs=[
            pl.BlockSpec((R, K1), lambda i: (0, 0)),
            pl.BlockSpec((M2, 3 * L1), lambda i: (0, 0)),
            pl.BlockSpec((K1, L1), lambda i: (0, 0)),
            pl.BlockSpec((R, L1), lambda i: (0, 0)),
            pl.BlockSpec((3, L1, L2), lambda i: (0, 0, 0)),
            pl.BlockSpec((3 * L1, L2), lambda i: (0, 0)),
            pl.BlockSpec((1, L2), lambda i: (0, 0)),
        ],
        out_specs=pl.BlockSpec((M2, L2), lambda i: (0, 0)),
        compiler_params=pltpu.CompilerParams(
            dimension_semantics=("arbitrary",)),
    )(x1, rem_i2c, w1p, b1f, w2y, w2r, b2t)

    # Drop the inter-batch junk rows, restore (N, C2out, Ho, Wo).
    out = jnp.concatenate([out_slab[b * Hb: b * Hb + Ho] for b in range(N)], axis=0)
    out = out.reshape(N, Ho, Wo, C2out)
    return jnp.transpose(out, (0, 3, 1, 2)).astype(jnp.float32)


# ----------------------------------------------------------------------------
# Pure-JAX reference (NHWC, f32) for correctness check
# ----------------------------------------------------------------------------
def _ref_forward(x_nhwc, rem_nhwc, params, eps=1e-5):
    dn = ("NHWC", "HWIO", "NHWC")

    def conv(x, w, stride):
        wh = jnp.transpose(w, (2, 3, 1, 0))  # OIHW -> HWIO
        return lax.conv_general_dilated(x, wh, (stride, stride), [(1, 1), (1, 1)],
                                        dimension_numbers=dn,
                                        precision=lax.Precision.HIGHEST)

    def bn(x, g, b, m, v):
        return (x - m) / jnp.sqrt(v + eps) * g + b

    def lrelu(x):
        return jnp.where(x > 0, x, 0.01 * x)

    y = lrelu(bn(conv(x_nhwc, params["w1"], 2),
                 params["g1"], params["be1"], params["m1"], params["v1"]))
    z = jnp.concatenate([y, rem_nhwc], axis=-1)
    return lrelu(bn(conv(z, params["w2"], 1),
                    params["g2"], params["be2"], params["m2"], params["v2"]))


# ----------------------------------------------------------------------------
# Main
# ----------------------------------------------------------------------------
if __name__ == "__main__":
    # Conv2x(in_channels=8, out_channels=8), default flags -> conv2: 16 -> 16 channels.
    N, Cin, H, W = 2, 8, 16, 16
    Cout = 8
    Ho, Wo = H // 2, W // 2
    C2in, C2out = 2 * Cout, 2 * Cout

    key = jax.random.PRNGKey(0)
    kx, kr, kw1, kw2 = jax.random.split(key, 4)

    x = jax.random.normal(kx, (N, Cin, H, W), jnp.float32)
    rem = jax.random.normal(kr, (N, Cout, Ho, Wo), jnp.float32)

    ar1 = jnp.arange(Cout, dtype=jnp.float32)
    ar2 = jnp.arange(C2out, dtype=jnp.float32)
    params = {
        # torch conv weight layout: (out_channels, in_channels, 3, 3), bias=False
        "w1": 0.1 * jax.random.normal(kw1, (Cout, Cin, 3, 3), jnp.float32),
        "w2": 0.1 * jax.random.normal(kw2, (C2out, C2in, 3, 3), jnp.float32),
        # deterministic, non-trivial BN params (inference mode)
        "g1": 1.0 + 0.05 * ar1, "be1": 0.02 * ar1, "m1": 0.01 * ar1, "v1": 1.0 + 0.03 * ar1,
        "g2": 1.0 - 0.02 * ar2, "be2": -0.03 * ar2, "m2": -0.02 * ar2, "v2": 1.0 + 0.02 * ar2,
    }

    out = jax.jit(conv2x_forward)(x, rem, params)
    out = jax.block_until_ready(out)

    ref_nhwc = _ref_forward(jnp.transpose(x, (0, 2, 3, 1)),
                            jnp.transpose(rem, (0, 2, 3, 1)), params)
    ref = jnp.transpose(ref_nhwc, (0, 3, 1, 2))

    assert out.shape == (N, C2out, Ho, Wo)
    err = float(jnp.max(jnp.abs(out - ref)))
    # bf16 MXU inputs + bf16 output with f32 accumulation vs. a pure-f32 reference.
    assert err < 5e-2, f"mismatch vs reference: max abs err = {err}"

    print("KERNEL_OK")
</pallas_src>

<mosaic_0001>
module attributes {stable_mosaic.version = 11 : i64} {
  func.func @_conv2x_kernel(%arg0: i32, %arg1: memref<20x576xbf16, #tpu.memory_space<vmem>>, %arg2: memref<18x192xbf16, #tpu.memory_space<vmem>>, %arg3: memref<576x64xbf16, #tpu.memory_space<vmem>>, %arg4: memref<20x64xf32, #tpu.memory_space<vmem>>, %arg5: memref<3x64x128xbf16, #tpu.memory_space<vmem>>, %arg6: memref<192x128xbf16, #tpu.memory_space<vmem>>, %arg7: memref<1x128xf32, #tpu.memory_space<vmem>>, %arg8: memref<18x128xbf16, #tpu.memory_space<vmem>>) attributes {dimension_semantics = [#tpu.dimension_semantics<arbitrary>], iteration_bounds = array<i64: 1>, scalar_prefetch = 0 : i64, scratch_operands = 0 : i64, tpu.core_type = #tpu.core_type<tc>, window_params = [{pipeline_mode = #tpu.pipeline_mode<synchronous>, transform_indices = @transform_0, window_bounds = array<i64: 20, 576>}, {pipeline_mode = #tpu.pipeline_mode<synchronous>, transform_indices = @transform_1, window_bounds = array<i64: 18, 192>}, {pipeline_mode = #tpu.pipeline_mode<synchronous>, transform_indices = @transform_2, window_bounds = array<i64: 576, 64>}, {pipeline_mode = #tpu.pipeline_mode<synchronous>, transform_indices = @transform_3, window_bounds = array<i64: 20, 64>}, {pipeline_mode = #tpu.pipeline_mode<synchronous>, transform_indices = @transform_4, window_bounds = array<i64: 3, 64, 128>}, {pipeline_mode = #tpu.pipeline_mode<synchronous>, transform_indices = @transform_5, window_bounds = array<i64: 192, 128>}, {pipeline_mode = #tpu.pipeline_mode<synchronous>, transform_indices = @transform_6, window_bounds = array<i64: 1, 128>}, {pipeline_mode = #tpu.pipeline_mode<synchronous>, transform_indices = @transform_7, window_bounds = array<i64: 18, 128>}]} {
    %c0 = arith.constant 0 : index
    %c0_0 = arith.constant 0 : index
    %0 = vector.load %arg1[%c0, %c0_0] : memref<20x576xbf16, #tpu.memory_space<vmem>>, vector<20x576xbf16>
    %c0_1 = arith.constant 0 : index
    %c0_2 = arith.constant 0 : index
    %1 = vector.load %arg3[%c0_1, %c0_2] : memref<576x64xbf16, #tpu.memory_space<vmem>>, vector<576x64xbf16>
    %cst = arith.constant dense<0.000000e+00> : vector<20x64xf32>
    %2 = tpu.matmul %0, %1, %cst {dimension_numbers = #tpu.dot_dimension_numbers<[1], [0], [0], [1], [0, 0, 1, 1], [], []>} : vector<20x576xbf16>, vector<576x64xbf16>, vector<20x64xf32> -> vector<20x64xf32>
    %c0_3 = arith.constant 0 : index
    %c0_4 = arith.constant 0 : index
    %3 = vector.load %arg4[%c0_3, %c0_4] : memref<20x64xf32, #tpu.memory_space<vmem>>, vector<20x64xf32>
    %4 = arith.addf %2, %3 : vector<20x64xf32>
    %cst_5 = arith.constant 0.00999999977 : f32
    %5 = vector.broadcast %cst_5 : f32 to vector<20x64xf32>
    %6 = arith.mulf %5, %4 : vector<20x64xf32>
    %7 = arith.maximumf %4, %6 : vector<20x64xf32>
    %8 = arith.truncf %7 : vector<20x64xf32> to vector<20x64xbf16>
    %c0_6 = arith.constant 0 : index
    %c0_7 = arith.constant 0 : index
    %9 = vector.load %arg2[%c0_6, %c0_7] : memref<18x192xbf16, #tpu.memory_space<vmem>>, vector<18x192xbf16>
    %c0_8 = arith.constant 0 : index
    %c0_9 = arith.constant 0 : index
    %10 = vector.load %arg6[%c0_8, %c0_9] : memref<192x128xbf16, #tpu.memory_space<vmem>>, vector<192x128xbf16>
    %cst_10 = arith.constant dense<0.000000e+00> : vector<18x128xf32>
    %11 = tpu.matmul %9, %10, %cst_10 {dimension_numbers = #tpu.dot_dimension_numbers<[1], [0], [0], [1], [0, 0, 1, 1], [], []>} : vector<18x192xbf16>, vector<192x128xbf16>, vector<18x128xf32> -> vector<18x128xf32>
    %12 = vector.extract_strided_slice %8 {offsets = [0, 0], sizes = [18, 64], strides = [1, 1]} : vector<20x64xbf16> to vector<18x64xbf16>
    %c0_11 = arith.constant 0 : index
    %c0_12 = arith.constant 0 : index
    %c0_13 = arith.constant 0 : index
    %13 = vector.load %arg5[%c0_11, %c0_12, %c0_13] : memref<3x64x128xbf16, #tpu.memory_space<vmem>>, vector<1x64x128xbf16>
    %14 = vector.shape_cast %13 : vector<1x64x128xbf16> to vector<64x128xbf16>
    %cst_14 = arith.constant dense<0.000000e+00> : vector<18x128xf32>
    %15 = tpu.matmul %12, %14, %cst_14 {dimension_numbers = #tpu.dot_dimension_numbers<[1], [0], [0], [1], [0, 0, 1, 1], [], []>} : vector<18x64xbf16>, vector<64x128xbf16>, vector<18x128xf32> -> vector<18x128xf32>
    %16 = arith.addf %11, %15 : vector<18x128xf32>
    %17 = vector.extract_strided_slice %8 {offsets = [1, 0], sizes = [18, 64], strides = [1, 1]} : vector<20x64xbf16> to vector<18x64xbf16>
    %c1 = arith.constant 1 : index
    %c0_15 = arith.constant 0 : index
    %c0_16 = arith.constant 0 : index
    %18 = vector.load %arg5[%c1, %c0_15, %c0_16] : memref<3x64x128xbf16, #tpu.memory_space<vmem>>, vector<1x64x128xbf16>
    %19 = vector.shape_cast %18 : vector<1x64x128xbf16> to vector<64x128xbf16>
    %cst_17 = arith.constant dense<0.000000e+00> : vector<18x128xf32>
    %20 = tpu.matmul %17, %19, %cst_17 {dimension_numbers = #tpu.dot_dimension_numbers<[1], [0], [0], [1], [0, 0, 1, 1], [], []>} : vector<18x64xbf16>, vector<64x128xbf16>, vector<18x128xf32> -> vector<18x128xf32>
    %21 = arith.addf %16, %20 : vector<18x128xf32>
    %22 = vector.extract_strided_slice %8 {offsets = [2, 0], sizes = [18, 64], strides = [1, 1]} : vector<20x64xbf16> to vector<18x64xbf16>
    %c2 = arith.constant 2 : index
    %c0_18 = arith.constant 0 : index
    %c0_19 = arith.constant 0 : index
    %23 = vector.load %arg5[%c2, %c0_18, %c0_19] : memref<3x64x128xbf16, #tpu.memory_space<vmem>>, vector<1x64x128xbf16>
    %24 = vector.shape_cast %23 : vector<1x64x128xbf16> to vector<64x128xbf16>
    %cst_20 = arith.constant dense<0.000000e+00> : vector<18x128xf32>
    %25 = tpu.matmul %22, %24, %cst_20 {dimension_numbers = #tpu.dot_dimension_numbers<[1], [0], [0], [1], [0, 0, 1, 1], [], []>} : vector<18x64xbf16>, vector<64x128xbf16>, vector<18x128xf32> -> vector<18x128xf32>
    %26 = arith.addf %21, %25 : vector<18x128xf32>
    %c0_21 = arith.constant 0 : index
    %c0_22 = arith.constant 0 : index
    %27 = vector.load %arg7[%c0_21, %c0_22] : memref<1x128xf32, #tpu.memory_space<vmem>>, vector<1x128xf32>
    %28 = vector.broadcast %27 : vector<1x128xf32> to vector<18x128xf32>
    %29 = arith.addf %26, %28 : vector<18x128xf32>
    %cst_23 = arith.constant 0.00999999977 : f32
    %30 = vector.broadcast %cst_23 : f32 to vector<18x128xf32>
    %31 = arith.mulf %30, %29 : vector<18x128xf32>
    %32 = arith.maximumf %29, %31 : vector<18x128xf32>
    %33 = arith.truncf %32 : vector<18x128xf32> to vector<18x128xbf16>
    %c0_24 = arith.constant 0 : index
    %c0_25 = arith.constant 0 : index
    %34 = vector.load %arg8[%c0_24, %c0_25] : memref<18x128xbf16, #tpu.memory_space<vmem>>, vector<18x128xbf16>
    tpu.vector_store %arg8[%c0_24, %c0_25], %33 {strides = array<i32>} : memref<18x128xbf16, #tpu.memory_space<vmem>>, vector<18x128xbf16>,
    return
  }
  func.func @transform_0(%arg0: i32) -> (i32, i32) {
    %c0_i32 = arith.constant 0 : i32
    %c0_i32_0 = arith.constant 0 : i32
    %c0_i32_1 = arith.constant 0 : i32
    return %c0_i32, %c0_i32_0 : i32, i32
  }
  func.func @transform_1(%arg0: i32) -> (i32, i32) {
    %c0_i32 = arith.constant 0 : i32
    %c0_i32_0 = arith.constant 0 : i32
    %c0_i32_1 = arith.constant 0 : i32
    return %c0_i32, %c0_i32_0 : i32, i32
  }
  func.func @transform_2(%arg0: i32) -> (i32, i32) {
    %c0_i32 = arith.constant 0 : i32
    %c0_i32_0 = arith.constant 0 : i32
    %c0_i32_1 = arith.constant 0 : i32
    return %c0_i32, %c0_i32_0 : i32, i32
  }
  func.func @transform_3(%arg0: i32) -> (i32, i32) {
    %c0_i32 = arith.constant 0 : i32
    %c0_i32_0 = arith.constant 0 : i32
    %c0_i32_1 = arith.constant 0 : i32
    return %c0_i32, %c0_i32_0 : i32, i32
  }
  func.func @transform_4(%arg0: i32) -> (i32, i32, i32) {
    %c0_i32 = arith.constant 0 : i32
    %c0_i32_0 = arith.constant 0 : i32
    %c0_i32_1 = arith.constant 0 : i32
    %c0_i32_2 = arith.constant 0 : i32
    return %c0_i32, %c0_i32_0, %c0_i32_1 : i32, i32, i32
  }
  func.func @transform_5(%arg0: i32) -> (i32, i32) {
    %c0_i32 = arith.constant 0 : i32
    %c0_i32_0 = arith.constant 0 : i32
    %c0_i32_1 = arith.constant 0 : i32
    return %c0_i32, %c0_i32_0 : i32, i32
  }
  func.func @transform_6(%arg0: i32) -> (i32, i32) {
    %c0_i32 = arith.constant 0 : i32
    %c0_i32_0 = arith.constant 0 : i32
    %c0_i32_1 = arith.constant 0 : i32
    return %c0_i32, %c0_i32_0 : i32, i32
  }
  func.func @transform_7(%arg0: i32) -> (i32, i32) {
    %c0_i32 = arith.constant 0 : i32
    %c0_i32_0 = arith.constant 0 : i32
    %c0_i32_1 = arith.constant 0 : i32
    return %c0_i32, %c0_i32_0 : i32, i32
  }
}

</mosaic_0001>

<bundles_post_ra>
// kernel: tile.24
= control target key start
LH: loop header
LB: loop body
LE: loop exit
PB: predicated region body
PF: predicated region fallthrough
CT: control target
= control target key end

     0   :  { %s22_s0 = inlined_call_operand.vmem [shape: f32[8], index: 0, kind: input, shape index: {}]   ;;  %s23_s1 = inlined_call_operand.vmem [shape: f32[8,8], index: 1, kind: output, shape index: {}]  }
   0x1   :  { %v4_v0 = vld [vmem:[%s22_s0] ss:$0 sm:$0xff] }
   0x2   :  { %5 = vst [vmem:[%s23_s1] sm:$0xff] %v4_v0 }

// kernel: mul.17
= control target key start
LH: loop header
LB: loop body
LE: loop exit
PB: predicated region body
PF: predicated region fallthrough
CT: control target
= control target key end

     0   :  { %s67_s10 = smov 56   ;;  %s68_s11 = smov 40   ;;  %vm3_vm0 = vcmask 64512   ;;  %vm9_vm1 = vcmask 523712   ;;  %vm15_vm2 = vcmask 458112   ;;  %vm21_vm3 = vcmask 392512   ;;  %s111_s0 = inlined_call_operand.vmem [shape: f32[8,8], index: 0, kind: input, shape index: {}]   ;;  %s112_s1 = inlined_call_operand.vmem [shape: f32[64], index: 1, kind: output, shape index: {}]  }
   0x1   :  { %v53_v0 = vld [vmem:[%s111_s0 + $0x7] sm:$0x1]   ;;  %v55_v1 = vld [vmem:[%s111_s0 + $0x5] sm:$0x1]   ;;  %v54_v2 = vld [vmem:[%s111_s0 + $0x6] sm:$0x1]  }
   0x2   :  { %7 = vrot.lane.b32.xlu0 %v53_v0, %s67_s10  ;;  %19 = vrot.lane.b32.xlu1 %v55_v1, %s68_s11  ;;  %v56_v3 = vld [vmem:[%s111_s0 + $0x4] sm:$0x1]   ;;  %v2_v4 = vld [vmem:[%s111_s0] sm:$0x1]   ;;  %s69_s18 = smov 48   ;;  %s70_s19 = smov 32  }
   0x3   :  { %4 = vst.msk [vmem:[#allocation0] sm:$0x1] %vm3_vm0, %v2_v4   ;;  %v57_v5 = vld [vmem:[%s111_s0 + $0x3] sm:$0x1]   ;;  %v58_v6 = vld [vmem:[%s111_s0 + $0x2] sm:$0x1]  }
   0x4   :  { %s71_s24 = smov 24   ;;  %s72_s25 = smov 16   ;;  %v59_v7 = vld [vmem:[%s111_s0 + $0x1] sm:$0x1]   ;;  %vm27_vm4 = vcmask 326912   ;;  %vm33_vm5 = vcmask 261312  }
   0x5   :  { %s73_s0 = smov 8   ;;  %vm39_vm6 = vcmask 195712   ;;  %vm45_vm7 = vcmask 130112  }
   0x6   :  { %13 = vrot.lane.b32.xlu0 %v54_v2, %s69_s18  ;;  %25 = vrot.lane.b32.xlu1 %v56_v3, %s70_s19 }
   0xa   :  { %31 = vrot.lane.b32.xlu0 %v57_v5, %s71_s24  ;;  %37 = vrot.lane.b32.xlu1 %v58_v6, %s72_s25 }
   0xe   :  { %43 = vrot.lane.b32.xlu0 %v59_v7, %s73_s0 }
  0x74   :  { %v8_v8 = vpop.permute.xlu0 %7   ;;  %v20_v9 = vpop.permute.xlu1 %19  }
  0x75   :  { %10 = vst.msk [vmem:[#allocation0] sm:$0x1] %vm9_vm1, %v8_v8  }
  0x78   :  { %v14_v10 = vpop.permute.xlu0 %13   ;;  %v26_v11 = vpop.permute.xlu1 %25  }
  0x79   :  { %16 = vst.msk [vmem:[#allocation0] sm:$0x1] %vm15_vm2, %v14_v10  }
  0x7a   :  { %22 = vst.msk [vmem:[#allocation0] sm:$0x1] %vm21_vm3, %v20_v9  }
  0x7b   :  { %28 = vst.msk [vmem:[#allocation0] sm:$0x1] %vm27_vm4, %v26_v11  }
  0x7c   :  { %v32_v12 = vpop.permute.xlu0 %31   ;;  %v38_v13 = vpop.permute.xlu1 %37  }
  0x7d   :  { %34 = vst.msk [vmem:[#allocation0] sm:$0x1] %vm33_vm5, %v32_v12  }
  0x7e   :  { %40 = vst.msk [vmem:[#allocation0] sm:$0x1] %vm39_vm6, %v38_v13  }
  0x80   :  { %v44_v14 = vpop.permute.xlu0 %43  }
  0x81   :  { %46 = vst.msk [vmem:[#allocation0] sm:$0x1] %vm45_vm7, %v44_v14  }
  0x88   :  { %v50_v15 = vld [vmem:[#allocation0] sm:$0x1] }
  0x89   :  { %52 = vst [vmem:[%s112_s1] sm:$0x1] %v50_v15 }

// kernel: tile.29
= control target key start
LH: loop header
LB: loop body
LE: loop exit
PB: predicated region body
PF: predicated region fallthrough
CT: control target
= control target key end

     0   :  { %s22_s0 = inlined_call_operand.vmem [shape: f32[16], index: 0, kind: input, shape index: {}]   ;;  %s23_s1 = inlined_call_operand.vmem [shape: f32[8,16], index: 1, kind: output, shape index: {}]  }
   0x1   :  { %v4_v0 = vld [vmem:[%s22_s0] ss:$0 sm:$0xff] }
   0x2   :  { %5 = vst [vmem:[%s23_s1] sm:$0xff] %v4_v0 }

// kernel: mul.21
= control target key start
LH: loop header
LB: loop body
LE: loop exit
PB: predicated region body
PF: predicated region fallthrough
CT: control target
= control target key end

     0   :  { %s67_s10 = smov 112   ;;  %s68_s11 = smov 80   ;;  %vm3_vm0 = vcmask 130048   ;;  %vm9_vm1 = vcmask 1048448   ;;  %vm15_vm2 = vcmask 917248   ;;  %vm21_vm3 = vcmask 786048   ;;  %s111_s0 = inlined_call_operand.vmem [shape: f32[8,16], index: 0, kind: input, shape index: {}]   ;;  %s112_s1 = inlined_call_operand.vmem [shape: f32[128], index: 1, kind: output, shape index: {}]  }
   0x1   :  { %v53_v0 = vld [vmem:[%s111_s0 + $0x7] sm:$0x1]   ;;  %v55_v1 = vld [vmem:[%s111_s0 + $0x5] sm:$0x1]   ;;  %v54_v2 = vld [vmem:[%s111_s0 + $0x6] sm:$0x1]  }
   0x2   :  { %7 = vrot.lane.b32.xlu0 %v53_v0, %s67_s10  ;;  %19 = vrot.lane.b32.xlu1 %v55_v1, %s68_s11  ;;  %v56_v3 = vld [vmem:[%s111_s0 + $0x4] sm:$0x1]   ;;  %v2_v4 = vld [vmem:[%s111_s0] sm:$0x1]   ;;  %s69_s18 = smov 96   ;;  %s70_s19 = smov 64  }
   0x3   :  { %4 = vst.msk [vmem:[#allocation0] sm:$0x1] %vm3_vm0, %v2_v4   ;;  %v57_v5 = vld [vmem:[%s111_s0 + $0x3] sm:$0x1]   ;;  %v58_v6 = vld [vmem:[%s111_s0 + $0x2] sm:$0x1]  }
   0x4   :  { %s71_s24 = smov 48   ;;  %s72_s25 = smov 32   ;;  %v59_v7 = vld [vmem:[%s111_s0 + $0x1] sm:$0x1]   ;;  %vm27_vm4 = vcmask 654848   ;;  %vm33_vm5 = vcmask 523648  }
   0x5   :  { %s73_s0 = smov 16   ;;  %vm39_vm6 = vcmask 392448   ;;  %vm45_vm7 = vcmask 261248  }
   0x6   :  { %13 = vrot.lane.b32.xlu0 %v54_v2, %s69_s18  ;;  %25 = vrot.lane.b32.xlu1 %v56_v3, %s70_s19 }
   0xa   :  { %31 = vrot.lane.b32.xlu0 %v57_v5, %s71_s24  ;;  %37 = vrot.lane.b32.xlu1 %v58_v6, %s72_s25 }
   0xe   :  { %43 = vrot.lane.b32.xlu0 %v59_v7, %s73_s0 }
  0x74   :  { %v8_v8 = vpop.permute.xlu0 %7   ;;  %v20_v9 = vpop.permute.xlu1 %19  }
  0x75   :  { %10 = vst.msk [vmem:[#allocation0] sm:$0x1] %vm9_vm1, %v8_v8  }
  0x78   :  { %v14_v10 = vpop.permute.xlu0 %13   ;;  %v26_v11 = vpop.permute.xlu1 %25  }
  0x79   :  { %16 = vst.msk [vmem:[#allocation0] sm:$0x1] %vm15_vm2, %v14_v10  }
  0x7a   :  { %22 = vst.msk [vmem:[#allocation0] sm:$0x1] %vm21_vm3, %v20_v9  }
  0x7b   :  { %28 = vst.msk [vmem:[#allocation0] sm:$0x1] %vm27_vm4, %v26_v11  }
  0x7c   :  { %v32_v12 = vpop.permute.xlu0 %31   ;;  %v38_v13 = vpop.permute.xlu1 %37  }
  0x7d   :  { %34 = vst.msk [vmem:[#allocation0] sm:$0x1] %vm33_vm5, %v32_v12  }
  0x7e   :  { %40 = vst.msk [vmem:[#allocation0] sm:$0x1] %vm39_vm6, %v38_v13  }
  0x80   :  { %v44_v14 = vpop.permute.xlu0 %43  }
  0x81   :  { %46 = vst.msk [vmem:[#allocation0] sm:$0x1] %vm45_vm7, %v44_v14  }
  0x88   :  { %v50_v15 = vld [vmem:[#allocation0] sm:$0x1] }
  0x89   :  { %52 = vst [vmem:[%s112_s1] sm:$0x1] %v50_v15 }

// kernel: tile.41
= control target key start
LH: loop header
LB: loop body
LE: loop exit
PB: predicated region body
PF: predicated region fallthrough
CT: control target
= control target key end

     0   :  { %s67_s10 = smov 112   ;;  %s68_s11 = smov 80   ;;  %vm3_vm0 = vcmask 130048   ;;  %vm9_vm1 = vcmask 1048448   ;;  %vm15_vm2 = vcmask 917248   ;;  %vm21_vm3 = vcmask 786048   ;;  %s111_s0 = inlined_call_operand.vmem [shape: f32[8,16], index: 0, kind: input, shape index: {}]   ;;  %s112_s1 = inlined_call_operand.vmem [shape: f32[1,128], index: 1, kind: output, shape index: {}]  }
   0x1   :  { %v53_v0 = vld [vmem:[%s111_s0 + $0x7] sm:$0x1]   ;;  %v55_v1 = vld [vmem:[%s111_s0 + $0x5] sm:$0x1]   ;;  %v54_v2 = vld [vmem:[%s111_s0 + $0x6] sm:$0x1]  }
   0x2   :  { %7 = vrot.lane.b32.xlu0 %v53_v0, %s67_s10  ;;  %19 = vrot.lane.b32.xlu1 %v55_v1, %s68_s11  ;;  %v56_v3 = vld [vmem:[%s111_s0 + $0x4] sm:$0x1]   ;;  %v2_v4 = vld [vmem:[%s111_s0] sm:$0x1]   ;;  %s69_s18 = smov 96   ;;  %s70_s19 = smov 64  }
   0x3   :  { %4 = vst.msk [vmem:[#allocation0] sm:$0x1] %vm3_vm0, %v2_v4   ;;  %v57_v5 = vld [vmem:[%s111_s0 + $0x3] sm:$0x1]   ;;  %v58_v6 = vld [vmem:[%s111_s0 + $0x2] sm:$0x1]  }
   0x4   :  { %s71_s24 = smov 48   ;;  %s72_s25 = smov 32   ;;  %v59_v7 = vld [vmem:[%s111_s0 + $0x1] sm:$0x1]   ;;  %vm27_vm4 = vcmask 654848   ;;  %vm33_vm5 = vcmask 523648  }
   0x5   :  { %s73_s0 = smov 16   ;;  %vm39_vm6 = vcmask 392448   ;;  %vm45_vm7 = vcmask 261248  }
   0x6   :  { %13 = vrot.lane.b32.xlu0 %v54_v2, %s69_s18  ;;  %25 = vrot.lane.b32.xlu1 %v56_v3, %s70_s19 }
   0xa   :  { %31 = vrot.lane.b32.xlu0 %v57_v5, %s71_s24  ;;  %37 = vrot.lane.b32.xlu1 %v58_v6, %s72_s25 }
   0xe   :  { %43 = vrot.lane.b32.xlu0 %v59_v7, %s73_s0 }
  0x74   :  { %v8_v8 = vpop.permute.xlu0 %7   ;;  %v20_v9 = vpop.permute.xlu1 %19  }
  0x75   :  { %10 = vst.msk [vmem:[#allocation0] sm:$0x1] %vm9_vm1, %v8_v8  }
  0x78   :  { %v14_v10 = vpop.permute.xlu0 %13   ;;  %v26_v11 = vpop.permute.xlu1 %25  }
  0x79   :  { %16 = vst.msk [vmem:[#allocation0] sm:$0x1] %vm15_vm2, %v14_v10  }
  0x7a   :  { %22 = vst.msk [vmem:[#allocation0] sm:$0x1] %vm21_vm3, %v20_v9  }
  0x7b   :  { %28 = vst.msk [vmem:[#allocation0] sm:$0x1] %vm27_vm4, %v26_v11  }
  0x7c   :  { %v32_v12 = vpop.permute.xlu0 %31   ;;  %v38_v13 = vpop.permute.xlu1 %37  }
  0x7d   :  { %34 = vst.msk [vmem:[#allocation0] sm:$0x1] %vm33_vm5, %v32_v12  }
  0x7e   :  { %40 = vst.msk [vmem:[#allocation0] sm:$0x1] %vm39_vm6, %v38_v13  }
  0x80   :  { %v44_v14 = vpop.permute.xlu0 %43  }
  0x81   :  { %46 = vst.msk [vmem:[#allocation0] sm:$0x1] %vm45_vm7, %v44_v14  }
  0x88   :  { %v50_v15 = vld [vmem:[#allocation0] sm:$0x1] }
  0x89   :  { %52 = vst [vmem:[%s112_s1] sm:$0x1] %v50_v15 }

// kernel: conv2x_forward.1
= control target key start
LH: loop header
LB: loop body
LE: loop exit
PB: predicated region body
PF: predicated region fallthrough
CT: control target
= control target key end

     0   :  { %v1336_v34 = vmov 0   ;;  %vm369_vm0 = vcmask 523264   ;;  %vm897_vm1 = vcmask 1046528   ;;  %vm791_vm2 = vsmask.f32 7424  ;;  %s1630_s2 = inlined_call_operand.vmem [shape: bf16[576,64], index: 2, kind: input, shape index: {}]   ;;  %s1631_s0 = inlined_call_operand.vmem [shape: bf16[20,576], index: 0, kind: input, shape index: {}]   ;;  %s1632_s5 = inlined_call_operand.vmem [shape: bf16[192,128], index: 5, kind: input, shape index: {}]   ;;  %s1633_s4 = inlined_call_operand.vmem [shape: bf16[3,64,128], index: 4, kind: input, shape index: {}]   ;;  %s1634_s1 = inlined_call_operand.vmem [shape: bf16[18,192], index: 1, kind: input, shape index: {}]   ;;  %s1635_s3 = inlined_call_operand.vmem [shape: f32[20,64], index: 3, kind: input, shape index: {}]   ;;  %s1636_s6 = inlined_call_operand.vmem [shape: f32[1,128], index: 6, kind: input, shape index: {}]   ;;  %s1637_s7 = inlined_call_operand.vmem [shape: bf16[18,128], index: 7, kind: output, shape index: {}]  }
   0x1   :  { %v1259_v0 = vld [vmem:[%s1630_s2 + $0x40] sm:$0xff]   ;;  %v1263_v4 = vld [vmem:[%s1630_s2 + $0x48] sm:$0xff]   ;;  %v1267_v8 = vld [vmem:[%s1630_s2 + $0x50] sm:$0xff]  }
   0x2   :  { %v1260_v1 = vld [vmem:[%s1630_s2 + $0xc0] sm:$0xff]   ;;  %1130 = vmatprep.subr.bf16.mxu0 %v1259_v0  ;;  %v1264_v5 = vld [vmem:[%s1630_s2 + $0xc8] sm:$0xff]   ;;  %v1268_v9 = vld [vmem:[%s1630_s2 + $0xd0] sm:$0xff]  }
   0x3   :  { %v1261_v2 = vld [vmem:[%s1630_s2] sm:$0xff]   ;;  %1158 = vmatprep.subr.bf16.mxu1 %v1260_v1  ;;  %v1265_v6 = vld [vmem:[%s1630_s2 + $0x8] sm:$0xff]   ;;  %v1269_v10 = vld [vmem:[%s1630_s2 + $0x10] sm:$0xff]  }
   0x4   :  { %v1262_v3 = vld [vmem:[%s1630_s2 + $0x80] sm:$0xff]   ;;  %1131 = vmatpush3.bf16.msra.mxu0 %v1261_v2  ;;  %v1266_v7 = vld [vmem:[%s1630_s2 + $0x88] sm:$0xff]   ;;  %v1270_v11 = vld [vmem:[%s1630_s2 + $0x90] sm:$0xff]  }
   0x5   :  { %1159 = vmatpush3.bf16.msra.mxu1 %v1262_v3  ;;  %1132 = vmatprep.subr.bf16.mxu0 %v1263_v4  ;;  %v1271_v12 = vld [vmem:[%s1630_s2 + $0x58] sm:$0xff]   ;;  %v1275_v16 = vld [vmem:[%s1630_s2 + $0x60] sm:$0xff]   ;;  %v1279_v20 = vld [vmem:[%s1630_s2 + $0x68] sm:$0xff]  }
   0x6   :  { %1160 = vmatprep.subr.bf16.mxu1 %v1264_v5  ;;  %v1272_v13 = vld [vmem:[%s1630_s2 + $0xd8] sm:$0xff]   ;;  %v1276_v17 = vld [vmem:[%s1630_s2 + $0xe0] sm:$0xff]   ;;  %v1280_v21 = vld [vmem:[%s1630_s2 + $0xe8] sm:$0xff]  }
   0x7   :  { %v1273_v14 = vld [vmem:[%s1630_s2 + $0x18] sm:$0xff]   ;;  %v1277_v18 = vld [vmem:[%s1630_s2 + $0x20] sm:$0xff]   ;;  %v1281_v22 = vld [vmem:[%s1630_s2 + $0x28] sm:$0xff]  }
   0x8   :  { %1133 = vmatpush3.bf16.msra.mxu0 %v1265_v6  ;;  %v1274_v15 = vld [vmem:[%s1630_s2 + $0x98] sm:$0xff]   ;;  %v1278_v19 = vld [vmem:[%s1630_s2 + $0xa0] sm:$0xff]   ;;  %v1282_v23 = vld [vmem:[%s1630_s2 + $0xa8] sm:$0xff]  }
   0x9   :  { %1161 = vmatpush3.bf16.msra.mxu1 %v1266_v7  ;;  %1134 = vmatprep.subr.bf16.mxu0 %v1267_v8  ;;  %v1283_v24 = vld [vmem:[%s1630_s2 + $0x70] sm:$0xff]   ;;  %v1287_v28 = vld [vmem:[%s1630_s2 + $0x78] sm:$0xff]   ;;  %v1296_v36 = vld [vmem:[%s1631_s0 + $0xc] ss:$20 sps:$4 sm:$0xff]  }
   0xa   :  { %1162 = vmatprep.subr.bf16.mxu1 %v1268_v9  ;;  %v1284_v25 = vld [vmem:[%s1630_s2 + $0xf0] sm:$0xff]   ;;  %v1288_v29 = vld [vmem:[%s1630_s2 + $0xf8] sm:$0xff]   ;;  %v1297_v37 = vld [vmem:[%s1630_s2 + $0x100] sm:$0xff]   ;;  %456 = vmatprep.mubr.bf16.mxu1 %v1296_v36 }
   0xb   :  { %v1285_v26 = vld [vmem:[%s1630_s2 + $0x30] sm:$0xff]   ;;  %v1289_v30 = vld [vmem:[%s1630_s2 + $0x38] sm:$0xff]   ;;  %v1298_v38 = vld [vmem:[%s1630_s2 + $0x108] sm:$0xff]  }
   0xc   :  { %1135 = vmatpush3.bf16.msra.mxu0 %v1269_v10  ;;  %v1286_v27 = vld [vmem:[%s1630_s2 + $0xb0] sm:$0xff]   ;;  %v1290_v31 = vld [vmem:[%s1630_s2 + $0xb8] sm:$0xff]   ;;  %v33_v39 = vld [vmem:[%s1631_s0 + $0x28] sm:$0x33] }
   0xd   :  { %1163 = vmatpush3.bf16.msra.mxu1 %v1270_v11  ;;  %1136 = vmatprep.subr.bf16.mxu0 %v1271_v12  ;;  %v1291_v32 = vld [vmem:[%s1631_s0] ss:$20 sps:$4 sm:$0xff]   ;;  %v1293_v33 = vld [vmem:[%s1631_s0 + $0x4] ss:$20 sps:$4 sm:$0xff]   ;;  %v1294_v35 = vld [vmem:[%s1631_s0 + $0x8] ss:$20 sps:$4 sm:$0xff]   ;;  %v1024_v40 = vcombine.high %v33_v39, %v33_v39  ;;  %v1023_v44 = vcombine.low %v33_v39, %v33_v39 }
   0xe   :  { %1164 = vmatprep.subr.bf16.mxu1 %v1272_v13  ;;  %408 = vmatprep.mubr.bf16.mxu0 %v1293_v33  ;;  %v34_v41 = vld [vmem:[%s1631_s0 + $0x30] sm:$0x33]  ;;  %v1304_v46 = vld [vmem:[%s1630_s2 + $0x118] sm:$0xff]   ;;  %v1307_v47 = vld [vmem:[%s1632_s5] sm:$0xff]  }
   0xf   :  { %v1026_v42 = vcombine.high %v34_v41, %v34_v41  ;;  %v1303_v43 = vld [vmem:[%s1630_s2 + $0x110] sm:$0xff]   ;;  %v1025_v45 = vcombine.low %v34_v41, %v34_v41  ;;  %v1308_v49 = vld [vmem:[%s1632_s5 + $0x8] sm:$0xff]   ;;  %v1306_v50 = vld [vmem:[%s1631_s0 + $0x38] ss:$0 sps:$4 sm:$0x33]  }
  0x10   :  { %1137 = vmatpush3.bf16.msra.mxu0 %v1273_v14  ;;  %v1305_v48 = vld [vmem:[%s1631_s0 + $0x10] ss:$20 sps:$4 sm:$0xff]   ;;  %v1310_v52 = vld [vmem:[%s1632_s5 + $0x18] sm:$0xff]   ;;  %v1312_v54 = vld [vmem:[%s1632_s5 + $0x28] sm:$0xff]  }
  0x11   :  { %1165 = vmatpush3.bf16.msra.mxu1 %v1274_v15  ;;  %1138 = vmatprep.subr.bf16.mxu0 %v1275_v16  ;;  %v1309_v51 = vld [vmem:[%s1632_s5 + $0x10] sm:$0xff]   ;;  %v1311_v53 = vld [vmem:[%s1632_s5 + $0x20] sm:$0xff]   ;;  %v1314_v56 = vld [vmem:[%s1632_s5 + $0x38] sm:$0xff]  }
  0x12   :  { %1166 = vmatprep.subr.bf16.mxu1 %v1276_v17  ;;  %v1313_v55 = vld [vmem:[%s1632_s5 + $0x30] sm:$0xff]   ;;  %v1315_v57 = vld [vmem:[%s1632_s5 + $0x40] sm:$0xff]   ;;  %v1316_v58 = vld [vmem:[%s1632_s5 + $0x48] sm:$0xff]  }
  0x13   :  { %v1317_v59 = vld [vmem:[%s1633_s4] sm:$0xff]   ;;  %v1318_v60 = vld [vmem:[%s1632_s5 + $0x50] sm:$0xff]   ;;  %v1319_v61 = vld [vmem:[%s1633_s4 + $0x8] sm:$0xff]  }
  0x14   :  { %1139 = vmatpush3.bf16.msra.mxu0 %v1277_v18  ;;  %v1320_v62 = vld [vmem:[%s1632_s5 + $0x58] sm:$0xff]   ;;  %v1321_v63 = vld [vmem:[%s1633_s4 + $0x10] sm:$0xff]   ;;  %v1322_v0 = vld [vmem:[%s1634_s1] ss:$8 sps:$4 sm:$0xff]  }
  0x15   :  { %1167 = vmatpush3.bf16.msra.mxu1 %v1278_v19  ;;  %1140 = vmatprep.subr.bf16.mxu0 %v1279_v20  ;;  %v1324_v1 = vld [vmem:[%s1634_s1 + $0x4] ss:$8 sps:$4 sm:$0xff]   ;;  %v1325_v2 = vld [vmem:[%s1633_s4 + $0x18] sm:$0xff]   ;;  %v530_v3 = vld [vmem:[%s1634_s1 + $0x10] sm:$0x11] }
  0x16   :  { %1168 = vmatprep.subr.bf16.mxu1 %v1280_v21  ;;  %v1075_v4 = vcombine.high %v530_v3, %v530_v3  ;;  %v1327_v5 = vld [vmem:[%s1633_s4 + $0x20] sm:$0xff]   ;;  %v1074_v6 = vcombine.low %v530_v3, %v530_v3  ;;  %v109_v16 = vld [vmem:[%s1635_s3 + $0x8] sm:$0xff] }
  0x17   :  { %v108_v9 = vld [vmem:[%s1635_s3] sm:$0xff] }
  0x18   :  { %1141 = vmatpush3.bf16.msra.mxu0 %v1281_v22 }
  0x19   :  { %1169 = vmatpush3.bf16.msra.mxu1 %v1282_v23  ;;  %1142 = vmatprep.subr.bf16.mxu0 %v1283_v24 }
  0x1a   :  { %1170 = vmatprep.subr.bf16.mxu1 %v1284_v25 }
  0x1c   :  { %1143 = vmatpush3.bf16.msra.mxu0 %v1285_v26 }
  0x1d   :  { %1171 = vmatpush3.bf16.msra.mxu1 %v1286_v27  ;;  %1144 = vmatprep.subr.bf16.mxu0 %v1287_v28  ;;  %v110_v27 = vld [vmem:[%s1635_s3 + $0x10] sm:$0xf] }
  0x1e   :  { %1172 = vmatprep.subr.bf16.mxu1 %v1288_v29 }
  0x20   :  { %1145 = vmatpush3.bf16.msra.mxu0 %v1289_v30 }
  0x21   :  { %1173 = vmatpush3.bf16.msra.mxu1 %v1290_v31  ;;  %734 = vmatprep.subr.bf16.mxu0 %v1336_v34 }
  0x22   :  { %1210 = vmatprep.subr.bf16.mxu1 %v1297_v37 }
  0x23   :  { %409 = vmatmul.mubr.bf16.vlgmr.msra.gmra.mrb[0].mxu0 %v1291_v32 }
  0x24   :  { %457 = vmatmul.mubr.bf16.vlgmr.msra.gmra.mrb[0].mxu1 %v1294_v35  ;;  %416 = vmatprep.mubr.bf16.mxu0 %v1024_v40 }
  0x25   :  { %1211 = vmatpush3.bf16.msra.mxu1 %v1297_v37  ;;  %464 = vmatprep.mubr.bf16.mxu1 %v1026_v42 }
  0x26   :  { %1212 = vmatprep.subr.bf16.mxu1 %v1298_v38  ;;  %735 = vmatpush1.bf16.msra.mxu0 %v1307_v47 }
  0x27   :  { %736 = vmatprep.subr.bf16.mxu0 %v1336_v34 }
  0x29   :  { %1213 = vmatpush3.bf16.msra.mxu1 %v1298_v38 }
  0x2a   :  { %1214 = vmatprep.subr.bf16.mxu1 %v1303_v43  ;;  %737 = vmatpush1.bf16.msra.mxu0 %v1308_v49 }
  0x2b   :  { %417 = vmatmul.mubr.bf16.gmra.mrb[4].mxu0 %v1023_v44  ;;  %738 = vmatprep.subr.bf16.mxu0 %v1336_v34 }
  0x2c   :  { %465 = vmatmul.mubr.bf16.gmra.mrb[4].mxu1 %v1025_v45  ;;  %1088 = vmatprep.mubr.msk.bf16.mxu0 %vm369_vm0, %v1324_v1  ;;  %v1331_v1 = vld [vmem:[%s1633_s4 + $0x38] sm:$0xff]  }
  0x2d   :  { %1215 = vmatpush3.bf16.msra.mxu1 %v1303_v43  ;;  %1218 = vmatprep.mubr.msk.bf16.mxu1 %vm369_vm0, %v1305_v48 }
  0x2e   :  { %1216 = vmatprep.subr.bf16.mxu1 %v1304_v46  ;;  %739 = vmatpush1.bf16.msra.mxu0 %v1309_v51 }
  0x2f   :  { %740 = vmatprep.subr.bf16.mxu0 %v1336_v34 }
  0x31   :  { %1217 = vmatpush3.bf16.msra.mxu1 %v1304_v46 }
  0x32   :  { %741 = vmatpush1.bf16.msra.mxu0 %v1310_v52  ;;  %1222 = vmatprep.subr.bf16.mxu1 %v1317_v59 }
  0x33   :  { %742 = vmatprep.subr.bf16.mxu0 %v1336_v34 }
  0x34   :  { %1219 = vmatmul.mubr.msk.bf16.vlgmr.msra.gmra.mrb[8].mxu1 %vm369_vm0, %v1306_v50 }
  0x35   :  { %1223 = vmatpush3.bf16.msra.mxu1 %v1317_v59 }
  0x36   :  { %743 = vmatpush1.bf16.msra.mxu0 %v1311_v53  ;;  %1224 = vmatprep.subr.bf16.mxu1 %v1319_v61  ;;  %v1329_v53 = vld [vmem:[%s1633_s4 + $0x28] sm:$0xff]  }
  0x37   :  { %744 = vmatprep.subr.bf16.mxu0 %v1336_v34 }
  0x39   :  { %1225 = vmatpush3.bf16.msra.mxu1 %v1319_v61  ;;  %v1330_v61 = vld [vmem:[%s1633_s4 + $0x30] sm:$0xff]  }
  0x3a   :  { %745 = vmatpush1.bf16.msra.mxu0 %v1312_v54  ;;  %1226 = vmatprep.subr.bf16.mxu1 %v1321_v63 }
  0x3b   :  { %746 = vmatprep.subr.bf16.mxu0 %v1336_v34 }
  0x3d   :  { %1227 = vmatpush3.bf16.msra.mxu1 %v1321_v63 }
  0x3e   :  { %747 = vmatpush1.bf16.msra.mxu0 %v1313_v55  ;;  %1228 = vmatprep.subr.bf16.mxu1 %v1325_v2 }
  0x3f   :  { %748 = vmatprep.subr.bf16.mxu0 %v1336_v34 }
  0x41   :  { %1229 = vmatpush3.bf16.msra.mxu1 %v1325_v2  ;;  %v1332_v2 = vld [vmem:[%s1633_s4 + $0x40] sm:$0xff]  }
  0x42   :  { %749 = vmatpush1.bf16.msra.mxu0 %v1314_v56  ;;  %1234 = vmatprep.subr.bf16.mxu1 %v1327_v5 }
  0x43   :  { %750 = vmatprep.subr.bf16.mxu0 %v1336_v34 }
  0x46   :  { %751 = vmatpush1.bf16.msra.mxu0 %v1315_v57 }
  0x47   :  { %752 = vmatprep.subr.bf16.mxu0 %v1336_v34 }
  0x4a   :  { %753 = vmatpush1.bf16.msra.mxu0 %v1316_v58 }
  0x4b   :  { %754 = vmatprep.subr.bf16.mxu0 %v1336_v34 }
  0x4e   :  { %755 = vmatpush1.bf16.msra.mxu0 %v1318_v60 }
  0x4f   :  { %756 = vmatprep.subr.bf16.mxu0 %v1336_v34 }
  0x52   :  { %757 = vmatpush1.bf16.msra.mxu0 %v1320_v62 }
  0x55   :  { %767 = vmatmul.mubr.bf16.vlgmr.msra.gmra.mrb[8].mxu0 %v1322_v0 }
  0x56   :  { %1089 = vmatprep.mubr.msk.bf16.mxu0 %vm369_vm0, %v1075_v4 }
  0x5d   :  { %775 = vmatmul.mubr.bf16.gmra.mrb[12].mxu0 %v1074_v6  ;;  %v1334_v6 = vld [vmem:[%s1633_s4 + $0x50] sm:$0xff]  }
  0xf6   :  { %v1146_v7 = vpop.f32.mrb[0].mxu0 }
  0xf7   :  { %v1174_v8 = vpop.f32.mrb[0].mxu1  ;;  %v1147_v10 = vpop.f32.mrb[1].mxu0 }
  0xf8   :  { %v1148_v11 = vadd.f32 %v1147_v10, %v1146_v7  ;;  %v1175_v12 = vpop.f32.mrb[1].mxu1  ;;  %v1149_v13 = vpop.f32.mrb[2].mxu0  ;;  %v1335_v7 = vld [vmem:[%s1633_s4 + $0x58] sm:$0xff]  }
  0xf9   :  { %v1176_v14 = vadd.f32 %v1175_v12, %v1174_v8  ;;  %v1177_v15 = vpop.f32.mrb[2].mxu1  ;;  %v1150_v17 = vpop.f32.mrb[3].mxu0 }
  0xfa   :  { %v411_v18 = vadd.f32 %v1148_v11, %v108_v9  ;;  %v1151_v19 = vadd.f32 %v1150_v17, %v1149_v13  ;;  %v1178_v20 = vpop.f32.mrb[3].mxu1 }
  0xfb   :  { %v1179_v21 = vadd.f32 %v1178_v20, %v1177_v15 }
  0xfc   :  { %v414_v22 = vadd.f32 %v1151_v19, %v109_v16  ;;  %v459_v23 = vadd.f32 %v1176_v14, %v411_v18 }
  0xfe   :  { %v1152_v24 = vpop.f32.mrb[4].mxu0  ;;  %v462_v25 = vadd.f32 %v1179_v21, %v414_v22 }
  0xff   :  { %v1180_v26 = vpop.f32.mrb[4].mxu1  ;;  %v1153_v28 = vpop.f32.mrb[5].mxu0 }
 0x100   :  { %v1154_v29 = vadd.f32 %v1153_v28, %v1152_v24  ;;  %v1181_v30 = vpop.f32.mrb[5].mxu1  ;;  %v1155_v31 = vpop.f32.mrb[6].mxu0 }
 0x101   :  { %v1182_v32 = vadd.f32 %v1181_v30, %v1180_v26  ;;  %v1183_v33 = vpop.f32.mrb[6].mxu1  ;;  %v1156_v34 = vpop.f32.mrb[7].mxu0  ;;  %v1118_v31 = vld [vmem:[%s1636_s6] ss:$0 sm:$0xff] }
 0x102   :  { %v419_v35 = vadd.f32 %v1154_v29, %v110_v27  ;;  %v1184_v36 = vpop.f32.mrb[7].mxu1 }
 0x104   :  { %v467_v37 = vadd.f32 %v1182_v32, %v419_v35 }
 0x107   :  { %v1220_v38 = vpop.f32.mrb[8].mxu1 }
 0x108   :  { %v515_v39 = vadd.f32 %v1220_v38, %v467_v37  ;;  %v506_v40 = vpop.f32.mrb[9].mxu1 }
 0x109   :  { %v507_v41 = vadd.f32 %v506_v40, %v459_v23  ;;  %v1221_v42 = vpop.f32.mrb[10].mxu1 }
 0x10a   :  { %v522_v43 = vmul.f32 0.01, %v515_v39  ;;  %v509_v44 = vpop.f32.mrb[11].mxu1 }
 0x10b   :  { %v520_v45 = vmul.f32 0.01, %v507_v41  ;;  %v510_v46 = vadd.f32 %v509_v44, %v462_v25 }
 0x10c   :  { %v525_v47 = vmax.f32 %v515_v39, %v522_v43 }
 0x10d   :  { %v521_v48 = vmul.f32 0.01, %v510_v46  ;;  %v523_v50 = vmax.f32 %v507_v41, %v520_v45 }
 0x10e   :  { %v527_v49 = vpack.c.bf16 %v525_v47, %v525_v47 }
 0x10f   :  { %v524_v51 = vmax.f32 %v510_v46, %v521_v48 }
 0x110   :  { %v798_v55 = vshll.u32 %v527_v49, 16  ;;  %v899_v57 = vrot.slane %v527_v49, 1  ;;  %v802_v3 = vshrl.u32 %v527_v49, 16 }
 0x111   :  { %v526_v52 = vpack.c.bf16 %v524_v51, %v523_v50 }
 0x112   :  { %v800_v63 = vrot.slane %v798_v55, 1 }
 0x113   :  { %1230 = vmatprep.mubr.msk.bf16.mxu1 %vm369_vm0, %v526_v52  ;;  %v794_v54 = vshll.u32 %v526_v52, 16  ;;  %v898_v56 = vrot.slane %v526_v52, 1  ;;  %v792_v58 = vshrl.u32 %v526_v52, 16 }
 0x114   :  { %1231 = vmatmul.mubr.msk.bf16.vlgmr.msra.gmra.mrb[12].mxu1 %vm369_vm0, %v527_v49  ;;  %v804_v4 = vor.u32 %v802_v3, %v800_v63 }
 0x115   :  { %1235 = vmatpush3.bf16.msra.mxu1 %v1327_v5  ;;  %v796_v59 = vrot.slane %v794_v54, 1  ;;  %v900_v60 = vsel %vm897_vm1, %v898_v56, %v899_v57  ;;  %v1333_v5 = vld [vmem:[%s1633_s4 + $0x48] sm:$0xff]  }
 0x116   :  { %1236 = vmatprep.subr.bf16.mxu1 %v1329_v53 }
 0x117   :  { %v797_v62 = vor.u32 %v796_v59, %v792_v58 }
 0x119   :  { %1237 = vmatpush3.bf16.msra.mxu1 %v1329_v53  ;;  %v801_v0 = vsel %vm791_vm2, %v797_v62, %v800_v63 }
 0x11a   :  { %1242 = vmatprep.mubr.msk.bf16.mxu1 %vm369_vm0, %v801_v0  ;;  %1238 = vmatprep.subr.bf16.mxu1 %v1330_v61 }
 0x11d   :  { %1239 = vmatpush3.bf16.msra.mxu1 %v1330_v61 }
 0x11e   :  { %1240 = vmatprep.subr.bf16.mxu1 %v1331_v1 }
 0x121   :  { %1241 = vmatpush3.bf16.msra.mxu1 %v1331_v1 }
 0x122   :  { %1246 = vmatprep.subr.bf16.mxu1 %v1332_v2 }
 0x124   :  { %1243 = vmatmul.mubr.msk.bf16.vlgmr.msra.gmra.mrb[16].mxu1 %vm369_vm0, %v804_v4 }
 0x125   :  { %1247 = vmatpush3.bf16.msra.mxu1 %v1332_v2  ;;  %1254 = vmatprep.mubr.msk.bf16.mxu1 %vm369_vm0, %v900_v60 }
 0x126   :  { %1248 = vmatprep.subr.bf16.mxu1 %v1333_v5 }
 0x128   :  { %v768_v8 = vpop.f32.mrb[8].mxu0 }
 0x129   :  { %1249 = vmatpush3.bf16.msra.mxu1 %v1333_v5  ;;  %v770_v9 = vpop.f32.mrb[9].mxu0 }
 0x12a   :  { %1250 = vmatprep.subr.bf16.mxu1 %v1334_v6  ;;  %v771_v10 = vpop.f32.mrb[10].mxu0 }
 0x12b   :  { %v773_v11 = vpop.f32.mrb[11].mxu0 }
 0x12d   :  { %1251 = vmatpush3.bf16.msra.mxu1 %v1334_v6 }
 0x12e   :  { %1252 = vmatprep.subr.bf16.mxu1 %v1335_v7 }
 0x130   :  { %v776_v12 = vpop.f32.mrb[12].mxu0 }
 0x131   :  { %1253 = vmatpush3.bf16.msra.mxu1 %v1335_v7  ;;  %v778_v13 = vpop.f32.mrb[13].mxu0 }
 0x132   :  { %v779_v14 = vpop.f32.mrb[14].mxu0 }
 0x133   :  { %v780_v15 = vpop.f32.mrb[15].mxu0 }
 0x134   :  { %1255 = vmatmul.mubr.msk.bf16.vlgmr.msra.gmra.mrb[20].mxu1 %vm369_vm0, %v899_v57 }
 0x1e7   :  { %v1232_v16 = vpop.f32.mrb[12].mxu1 }
 0x1e8   :  { %v777_v17 = vadd.f32 %v1232_v16, %v776_v12  ;;  %v627_v18 = vpop.f32.mrb[13].mxu1 }
 0x1e9   :  { %v769_v19 = vadd.f32 %v768_v8, %v627_v18  ;;  %v1233_v20 = vpop.f32.mrb[14].mxu1 }
 0x1ea   :  { %v630_v21 = vpop.f32.mrb[15].mxu1 }
 0x1eb   :  { %v772_v22 = vadd.f32 %v771_v10, %v630_v21 }
 0x1f7   :  { %v1244_v23 = vpop.f32.mrb[16].mxu1 }
 0x1f8   :  { %v885_v24 = vadd.f32 %v1244_v23, %v777_v17  ;;  %v869_v25 = vpop.f32.mrb[17].mxu1 }
 0x1f9   :  { %v883_v26 = vadd.f32 %v869_v25, %v769_v19  ;;  %v1245_v27 = vpop.f32.mrb[18].mxu1 }
 0x1fa   :  { %v872_v28 = vpop.f32.mrb[19].mxu1 }
 0x1fb   :  { %v884_v29 = vadd.f32 %v872_v28, %v772_v22 }
 0x207   :  { %v1256_v30 = vpop.f32.mrb[20].mxu1 }
 0x208   :  { %v981_v32 = vadd.f32 %v1256_v30, %v885_v24  ;;  %v965_v33 = vpop.f32.mrb[21].mxu1 }
 0x209   :  { %v979_v34 = vadd.f32 %v965_v33, %v883_v26  ;;  %v1257_v35 = vpop.f32.mrb[22].mxu1 }
 0x20a   :  { %v991_v36 = vadd.f32 %v1118_v31, %v981_v32  ;;  %v968_v37 = vpop.f32.mrb[23].mxu1 }
 0x20b   :  { %v989_v38 = vadd.f32 %v1118_v31, %v979_v34  ;;  %v980_v39 = vadd.f32 %v968_v37, %v884_v29 }
 0x20c   :  { %v994_v40 = vmul.f32 0.01, %v991_v36 }
 0x20d   :  { %v992_v41 = vmul.f32 0.01, %v989_v38  ;;  %v990_v42 = vadd.f32 %v1118_v31, %v980_v39 }
 0x20e   :  { %v997_v43 = vmax.f32 %v991_v36, %v994_v40 }
 0x20f   :  { %v993_v44 = vmul.f32 0.01, %v990_v42  ;;  %v995_v46 = vmax.f32 %v989_v38, %v992_v41 }
 0x210   :  { %v1124_v45 = vpack.c.bf16 %v997_v43, %v997_v43 }
 0x211   :  { %v996_v47 = vmax.f32 %v990_v42, %v993_v44 }
 0x212   :  { %1013 = vst [vmem:[%s1637_s7 + $0x8] sm:$0x1] %v1124_v45 }
 0x213   :  { %v1128_v48 = vpack.c.bf16 %v996_v47, %v995_v46 }
 0x215   :  { %1129 = vst [vmem:[%s1637_s7] sm:$0xff] %v1128_v48  }

</bundles_post_ra>
